<compile_context>
chip_gen: v7x
topology: tpu7x:2x2x1
jax: 0.10.0
libtpu: 0.0.40
codegen_flags: <defaults>
</compile_context>

<pallas_src>
import functools

import jax
import jax.numpy as jnp
from jax.experimental import pallas as pl
from jax.experimental.pallas import tpu as pltpu


def _se_kernel(x_ref, w1_ref, b1_ref, w2_ref, b2_ref, o_ref, *, inv_hw):
    # Squeeze: global average pool over the (lane) spatial axis, f32 accumulate.
    pooled = jnp.sum(x_ref[...].astype(jnp.float32), axis=-1) * inv_hw       # (TB, C)

    # Excite: Linear(in->mid) + ReLU6, Linear(mid->out) + HardSwish.
    h = jnp.dot(pooled, w1_ref[...], preferred_element_type=jnp.float32) + b1_ref[...]
    h = jnp.clip(h, 0.0, 6.0)
    y = jnp.dot(h, w2_ref[...], preferred_element_type=jnp.float32) + b2_ref[...]
    s = y * jnp.clip(y + 3.0, 0.0, 6.0) * (1.0 / 6.0)                         # (TB, C)

    # Gate: re-read x from VMEM (cheap; avoids holding the slab live in vregs
    # across the matmuls) and multiply in the input dtype so the streaming
    # multiply is native-width on v6e/v7x (identical math for f32 inputs).
    o_ref[...] = x_ref[...] * s.astype(o_ref.dtype)[:, :, None]


def squeeze_and_excite(x_nchw, w1, b1, w2, b2):
    """x_nchw: (B, C, H, W).  Weights follow PyTorch Linear conventions but are
    passed pre-transposed: w1 (C, mid), w2 (mid, C)."""
    B, C, H, W = x_nchw.shape
    HW = H * W
    mid = w1.shape[1]
    dtype = x_nchw.dtype
    itemsize = jnp.dtype(dtype).itemsize

    # No padding / extra HBM copies: true spatial length, true batch length.
    x_flat = x_nchw.reshape(B, C, HW)

    weight_itemsize = jnp.dtype(w1.dtype).itemsize
    weight_bytes = (C * mid + mid + mid * C + C) * weight_itemsize

    # Per-generation VMEM budget: query capacity, leave headroom below physical
    # (v7x = 64 MiB, v5e/v6e = 128 MiB); fall back to the smallest (v7x) size.
    try:
        vmem_cap = int(pltpu.get_tpu_info().vmem_capacity_bytes)
    except Exception:
        vmem_cap = 64 * 1024 * 1024
    budget = max(16 * 1024 * 1024,
                 min(vmem_cap - 8 * 1024 * 1024, 112 * 1024 * 1024))

    # Batch tile: target ~8 MiB per x block (amortizes per-grid-step overhead),
    # double-buffered in + out must still fit the budget.
    bytes_per_row = C * HW * itemsize
    block_target = min(8 * 1024 * 1024, budget // 4)
    TB = max(1, min(B, block_target // max(1, bytes_per_row)))
    # Keep >= 2 grid steps so ("parallel",) shards across v7x's 2 TensorCores
    # (harmless no-op on single-core v5e/v6e).
    if B >= 2:
        TB = min(TB, pl.cdiv(B, 2))

    grid = (pl.cdiv(B, TB),)

    block_bytes = TB * bytes_per_row
    # TODO(synk): if a single batch row (TB=1) still exceeds the block budget,
    # tile HW as a second grid axis with a pooled accumulator + two-pass gating.
    vmem_limit = int(min(budget,
                         max(16 * 1024 * 1024,
                             4 * block_bytes + 4 * weight_bytes + 2 * 1024 * 1024)))

    b1_2d = b1.reshape(1, mid)
    b2_2d = b2.reshape(1, C)

    kernel = functools.partial(_se_kernel, inv_hw=float(1.0 / HW))

    # Advisory cost: pool sum + gate mul (~2 flop/elem) + two tiny matmuls.
    flops = 2 * B * C * HW + 4 * B * C * mid
    bytes_accessed = 2 * B * C * HW * itemsize + weight_bytes

    out_flat = pl.pallas_call(
        kernel,
        out_shape=jax.ShapeDtypeStruct((B, C, HW), dtype),
        grid=grid,
        in_specs=[
            pl.BlockSpec((TB, C, HW), lambda b: (b, 0, 0)),
            pl.BlockSpec((C, mid), lambda b: (0, 0)),
            pl.BlockSpec((1, mid), lambda b: (0, 0)),
            pl.BlockSpec((mid, C), lambda b: (0, 0)),
            pl.BlockSpec((1, C), lambda b: (0, 0)),
        ],
        out_specs=pl.BlockSpec((TB, C, HW), lambda b: (b, 0, 0)),
        compiler_params=pltpu.CompilerParams(
            dimension_semantics=("parallel",),
            vmem_limit_bytes=vmem_limit,
        ),
        cost_estimate=pl.CostEstimate(
            flops=int(flops),
            bytes_accessed=int(bytes_accessed),
            transcendentals=0,
        ),
    )(x_flat, w1, b1_2d, w2, b2_2d)

    return out_flat.reshape(B, C, H, W)


def _reference(x, w1, b1, w2, b2):
    # Pure-JAX reference mirroring the PyTorch forward.
    pooled = jnp.mean(x, axis=(2, 3))                       # (B, C)
    h = jnp.clip(pooled @ w1 + b1, 0.0, 6.0)
    y = h @ w2 + b2
    s = y * jnp.clip(y + 3.0, 0.0, 6.0) / 6.0
    return s[:, :, None, None] * x


if __name__ == "__main__":
    # Module config: in_channels = out_channels = C, se_kernel_size = H = W,
    # divide = 4  ->  mid_channels = C // 4.
    B, C, H, W = 2, 16, 16, 16
    divide = 4
    mid = C // divide

    key = jax.random.PRNGKey(0)
    kx, kw1, kb1, kw2, kb2 = jax.random.split(key, 5)

    x = jax.random.normal(kx, (B, C, H, W), dtype=jnp.float32)

    # Deterministic init mimicking PyTorch Linear default: U(-1/sqrt(fan_in), ...).
    lim1 = 1.0 / jnp.sqrt(jnp.float32(C))
    lim2 = 1.0 / jnp.sqrt(jnp.float32(mid))
    w1 = jax.random.uniform(kw1, (C, mid), jnp.float32, -lim1, lim1)   # (in, mid), pre-transposed
    b1 = jax.random.uniform(kb1, (mid,), jnp.float32, -lim1, lim1)
    w2 = jax.random.uniform(kw2, (mid, C), jnp.float32, -lim2, lim2)   # (mid, out), pre-transposed
    b2 = jax.random.uniform(kb2, (C,), jnp.float32, -lim2, lim2)

    out = squeeze_and_excite(x, w1, b1, w2, b2)
    out = jax.block_until_ready(out)

    ref = _reference(x, w1, b1, w2, b2)
    assert out.shape == (B, C, H, W)
    assert jnp.allclose(out, ref, atol=1e-5, rtol=1e-5), "mismatch vs reference"

    print("KERNEL_OK")
</pallas_src>

<mosaic_0001>
module attributes {stable_mosaic.version = 11 : i64} {
  func.func @_se_kernel(%arg0: i32, %arg1: memref<1x16x256xf32, #tpu.memory_space<vmem>>, %arg2: memref<16x4xf32, #tpu.memory_space<vmem>>, %arg3: memref<1x4xf32, #tpu.memory_space<vmem>>, %arg4: memref<4x16xf32, #tpu.memory_space<vmem>>, %arg5: memref<1x16xf32, #tpu.memory_space<vmem>>, %arg6: memref<1x16x256xf32, #tpu.memory_space<vmem>>) attributes {dimension_semantics = [#tpu.dimension_semantics<parallel>], iteration_bounds = array<i64: 2>, scalar_prefetch = 0 : i64, scratch_operands = 0 : i64, tpu.core_type = #tpu.core_type<tc>, window_params = [{transform_indices = @transform_0, window_bounds = array<i64: 1, 16, 256>}, {pipeline_mode = #tpu.pipeline_mode<synchronous>, transform_indices = @transform_1, window_bounds = array<i64: 16, 4>}, {pipeline_mode = #tpu.pipeline_mode<synchronous>, transform_indices = @transform_2, window_bounds = array<i64: 1, 4>}, {pipeline_mode = #tpu.pipeline_mode<synchronous>, transform_indices = @transform_3, window_bounds = array<i64: 4, 16>}, {pipeline_mode = #tpu.pipeline_mode<synchronous>, transform_indices = @transform_4, window_bounds = array<i64: 1, 16>}, {transform_indices = @transform_5, window_bounds = array<i64: 1, 16, 256>}]} {
    %c0 = arith.constant 0 : index
    %c0_0 = arith.constant 0 : index
    %c0_1 = arith.constant 0 : index
    %0 = vector.load %arg1[%c0, %c0_0, %c0_1] : memref<1x16x256xf32, #tpu.memory_space<vmem>>, vector<1x16x256xf32>
    %cst = arith.constant dense<0.000000e+00> : vector<1x16xf32>
    %1 = vector.multi_reduction <add>, %0, %cst [2] : vector<1x16x256xf32> to vector<1x16xf32>
    %cst_2 = arith.constant 3.906250e-03 : f32
    %2 = vector.broadcast %cst_2 : f32 to vector<1x16xf32>
    %3 = arith.mulf %1, %2 : vector<1x16xf32>
    %c0_3 = arith.constant 0 : index
    %c0_4 = arith.constant 0 : index
    %4 = vector.load %arg2[%c0_3, %c0_4] : memref<16x4xf32, #tpu.memory_space<vmem>>, vector<16x4xf32>
    %cst_5 = arith.constant dense<0.000000e+00> : vector<1x4xf32>
    %5 = tpu.matmul %3, %4, %cst_5 {dimension_numbers = #tpu.dot_dimension_numbers<[1], [0], [0], [1], [0, 0, 1, 1], [], []>} : vector<1x16xf32>, vector<16x4xf32>, vector<1x4xf32> -> vector<1x4xf32>
    %c0_6 = arith.constant 0 : index
    %c0_7 = arith.constant 0 : index
    %6 = vector.load %arg3[%c0_6, %c0_7] : memref<1x4xf32, #tpu.memory_space<vmem>>, vector<1x4xf32>
    %7 = arith.addf %5, %6 : vector<1x4xf32>
    %cst_8 = arith.constant 0.000000e+00 : f32
    %cst_9 = arith.constant 6.000000e+00 : f32
    %8 = vector.broadcast %cst_8 : f32 to vector<1x4xf32>
    %9 = arith.maximumf %8, %7 : vector<1x4xf32>
    %10 = vector.broadcast %cst_9 : f32 to vector<1x4xf32>
    %11 = arith.minimumf %10, %9 : vector<1x4xf32>
    %c0_10 = arith.constant 0 : index
    %c0_11 = arith.constant 0 : index
    %12 = vector.load %arg4[%c0_10, %c0_11] : memref<4x16xf32, #tpu.memory_space<vmem>>, vector<4x16xf32>
    %cst_12 = arith.constant dense<0.000000e+00> : vector<1x16xf32>
    %13 = tpu.matmul %11, %12, %cst_12 {dimension_numbers = #tpu.dot_dimension_numbers<[1], [0], [0], [1], [0, 0, 1, 1], [], []>} : vector<1x4xf32>, vector<4x16xf32>, vector<1x16xf32> -> vector<1x16xf32>
    %c0_13 = arith.constant 0 : index
    %c0_14 = arith.constant 0 : index
    %14 = vector.load %arg5[%c0_13, %c0_14] : memref<1x16xf32, #tpu.memory_space<vmem>>, vector<1x16xf32>
    %15 = arith.addf %13, %14 : vector<1x16xf32>
    %cst_15 = arith.constant 3.000000e+00 : f32
    %16 = vector.broadcast %cst_15 : f32 to vector<1x16xf32>
    %17 = arith.addf %15, %16 : vector<1x16xf32>
    %cst_16 = arith.constant 0.000000e+00 : f32
    %cst_17 = arith.constant 6.000000e+00 : f32
    %18 = vector.broadcast %cst_16 : f32 to vector<1x16xf32>
    %19 = arith.maximumf %18, %17 : vector<1x16xf32>
    %20 = vector.broadcast %cst_17 : f32 to vector<1x16xf32>
    %21 = arith.minimumf %20, %19 : vector<1x16xf32>
    %22 = arith.mulf %15, %21 : vector<1x16xf32>
    %cst_18 = arith.constant 0.166666672 : f32
    %23 = vector.broadcast %cst_18 : f32 to vector<1x16xf32>
    %24 = arith.mulf %22, %23 : vector<1x16xf32>
    %c0_19 = arith.constant 0 : index
    %c0_20 = arith.constant 0 : index
    %c0_21 = arith.constant 0 : index
    %25 = vector.load %arg1[%c0_19, %c0_20, %c0_21] : memref<1x16x256xf32, #tpu.memory_space<vmem>>, vector<1x16x256xf32>
    %26 = vector.shape_cast %24 : vector<1x16xf32> to vector<1x16x1xf32>
    %27 = vector.broadcast %26 : vector<1x16x1xf32> to vector<1x16x256xf32>
    %28 = arith.mulf %25, %27 : vector<1x16x256xf32>
    %c0_22 = arith.constant 0 : index
    %c0_23 = arith.constant 0 : index
    %c0_24 = arith.constant 0 : index
    %29 = vector.load %arg6[%c0_22, %c0_23, %c0_24] : memref<1x16x256xf32, #tpu.memory_space<vmem>>, vector<1x16x256xf32>
    tpu.vector_store %arg6[%c0_22, %c0_23, %c0_24], %28 {strides = array<i32>} : memref<1x16x256xf32, #tpu.memory_space<vmem>>, vector<1x16x256xf32>,
    return
  }
  func.func @transform_0(%arg0: i32) -> (i32, i32, i32) {
    %c0_i32 = arith.constant 0 : i32
    %c0_i32_0 = arith.constant 0 : i32
    %c0_i32_1 = arith.constant 0 : i32
    return %arg0, %c0_i32, %c0_i32_0 : i32, i32, i32
  }
  func.func @transform_1(%arg0: i32) -> (i32, i32) {
    %c0_i32 = arith.constant 0 : i32
    %c0_i32_0 = arith.constant 0 : i32
    %c0_i32_1 = arith.constant 0 : i32
    return %c0_i32, %c0_i32_0 : i32, i32
  }
  func.func @transform_2(%arg0: i32) -> (i32, i32) {
    %c0_i32 = arith.constant 0 : i32
    %c0_i32_0 = arith.constant 0 : i32
    %c0_i32_1 = arith.constant 0 : i32
    return %c0_i32, %c0_i32_0 : i32, i32
  }
  func.func @transform_3(%arg0: i32) -> (i32, i32) {
    %c0_i32 = arith.constant 0 : i32
    %c0_i32_0 = arith.constant 0 : i32
    %c0_i32_1 = arith.constant 0 : i32
    return %c0_i32, %c0_i32_0 : i32, i32
  }
  func.func @transform_4(%arg0: i32) -> (i32, i32) {
    %c0_i32 = arith.constant 0 : i32
    %c0_i32_0 = arith.constant 0 : i32
    %c0_i32_1 = arith.constant 0 : i32
    return %c0_i32, %c0_i32_0 : i32, i32
  }
  func.func @transform_5(%arg0: i32) -> (i32, i32, i32) {
    %c0_i32 = arith.constant 0 : i32
    %c0_i32_0 = arith.constant 0 : i32
    %c0_i32_1 = arith.constant 0 : i32
    return %arg0, %c0_i32, %c0_i32_0 : i32, i32, i32
  }
}

</mosaic_0001>

<bundles_post_ra>
// kernel: tpu_custom_call.1
= control target key start
LH: loop header
LB: loop body
LE: loop exit
PB: predicated region body
PF: predicated region fallthrough
CT: control target
= control target key end

     0   :  { %10 = vsyncpa [#allocation3], 0  ;;  %s957_s0 = inlined_call_operand.hbm [shape: f32[2,16,256], index: 0, kind: input, shape index: {}]   ;;  %s958_s1 = inlined_call_operand.vmem [shape: f32[16,4], index: 1, kind: input, shape index: {}]   ;;  %s959_s2 = inlined_call_operand.vmem [shape: f32[1,4], index: 2, kind: input, shape index: {}]   ;;  %s960_s3 = inlined_call_operand.vmem [shape: f32[4,16], index: 3, kind: input, shape index: {}]   ;;  %s961_s4 = inlined_call_operand.vmem [shape: f32[1,16], index: 4, kind: input, shape index: {}]   ;;  %s962_s5 = inlined_call_operand.hbm [shape: f32[2,16,256], index: 5, kind: output, shape index: {}]  }
   0x1   :  { %12 = vsyncpa [#allocation3 + $0x1], 0 }
   0x2   :  { %13 = vsyncpa [#allocation4], 0 }
   0x3   :  { %15 = vsyncpa [#allocation4 + $0x1], 0  ;;  %s768_s18 = smov 0   ;;  %s770_s19 = smov 0  }
   0x4   :  { %s772_s20 = smov 0   ;;  %s774_s21 = smov 0  }
   0x5 LB: > { %s789_s22 = sadd.s32 4294967295, %s727_s21   ;;  %s539_s23 = sadd.s32 4294967294, %s727_s21   ;;  %s727_s21 = sphi %s774_s21, %s975_s21   ;;  %s723_s20 = sphi %s772_s20, %s974_s20   ;;  %s719_s19 = sphi %s770_s19, %s973_s19   ;;  %s715_s18 = sphi %s768_s18, %s972_s18  }
   0x6   : > { %s793_s24 = sadd.s32 1, %s727_s21   ;;  %s28_s25 = sadd.s32 1, %s723_s20 }
   0x7   : > { %s25_s26 = ssub.s32 %s727_s21, %s793_s24  ;;  %p35_p0 = scmp.ne.s32.totalorder %s723_s20, %s719_s19 }
   0x8   : > { %p26_p1 = scmp.eq.s32.totalorder %s25_s26, 0  ;;  %p36_p2 = scmp.eq.s32.totalorder %s727_s21, 0 }
   0x9   : > { %p41_p3 = scmp.ne.s32.totalorder %s719_s19, %s715_s18  ;;  %p42_p4 = scmp.eq.s32.totalorder %s789_s22, 0 }
   0xa   : > { %s805_s27 = scalar_select %p26_p1, %s723_s20, %s28_s25  }
   0xb   : > { %p807_p5 = por %p36_p2, %p35_p0  ;;  %p811_p6 = por %p42_p4, %p41_p3 }
   0xc   : > { %p149_p7 = scmp.eq.s32.totalorder %s789_s22, 1  ;;  %p155_p8 = scmp.eq.s32.totalorder %s539_s23, 1 }
   0xd   : > { %p590_p10 = scmp.lt.s32.totalorder %s727_s21, 2  ;;  %s187_s7 = sand.u32 1, %s723_s20  }
   0xe   : > { %p818_p11 = por %p149_p7, %p35_p0  ;;  %p822_p12 = por %p155_p8, %p41_p3 }
   0xf   : > { %s556_s8 = sshll.u32 %s727_s21, 9  ;;  %s542_s9 = sshll.u32 %s187_s7, 5 }
  0x10   : > { %s966_s30 = scalar_select %p818_p11, 1, 0 }
  0x11   : > { %s967_s6 = scalar_select %p822_p12, 1, 0 }
  0x12   : > { %s831_s12 = scalar_lea.hbm %s957_s0, %s556_s8  ;;  %s191_s13 = scalar_lea.vmem [#allocation2], %s542_s9 }
  0x13   : > { %s198_s14 = sshll.u32 %s191_s13, 4  ;;  %p835_p13 = pnand %p590_p10, %p807_p5  ;;  %s839_s14 = int_to_ptr.vmem [resolvable:$true] %s198_s14 }
  0x14   : > { %s841_s16 = scalar_lea.sflag [#allocation3], %s187_s7  ;;  %s631_s17 = scalar_lea.hbm %s831_s12, 512 }
  0x15   : > { %p632_p0 = scmp.ne.s32.totalorder %s831_s12, %s631_s17  ;;  %p633_p1 = pneg %p835_p13 }
  0x16   : > { %s636_s26 = scalar_lea.hbm %s957_s0, 1024  ;;  %p637_p4 = scmp.lt.u32.totalorder %s831_s12, %s957_s0 }
  0x17   : > { %p634_p2 = pnand %p633_p1, %p632_p0  ;;  %p638_p5 = scmp.lt.u32.totalorder %s636_s26, %s631_s17 }
  0x18   : > { %p640_p8 = scmp.lt.u32.totalorder %s631_s17, %s831_s12 }
  0x19   : > { %p635_p3 = pneg %p634_p2  ;;  %p639_p7 = por %p638_p5, %p637_p4 }
  0x1b   : > { %p641_p10 = por %p640_p8, %p639_p7 }
  0x1d   : > { %p642_p9 = pnand %p641_p10, %p635_p3 }
  0x1f   : > { %645 = shalt.err (!%p642_p9)
}
  0x20   : > { %s646_s7 = scalar_lea.vmem %s839_s14, 512  ;;  %s729_s9 = smov [#allocation2]  }
  0x21   : > { %p647_p0 = scmp.ne.s32.totalorder %s839_s14, %s646_s7  ;;  %s651_s10 = sshll.u32 %s729_s9, 4  ;;  %s652_s10 = int_to_ptr.vmem [resolvable:$false] %s651_s10 }
  0x22   : > { %s653_s11 = scalar_lea.vmem %s652_s10, 1024  ;;  %p654_p11 = scmp.lt.s32.totalorder %s839_s14, %s652_s10 }
  0x23   : > { %p649_p2 = pnand %p647_p0, %p633_p1  ;;  %p655_p4 = scmp.lt.s32.totalorder %s653_s11, %s646_s7 }
  0x25   : > { %p650_p12 = pneg %p649_p2  ;;  %p656_p5 = por %p655_p4, %p654_p11 }
  0x27   : > { %p657_p7 = pnand %p656_p5, %p650_p12 }
  0x29   : > { %660 = shalt.err (!%p657_p7)
}
  0x2a   : > { %s730_s13 = smov 256   ;;  %s731_s17 = smov 16  }
  0x2b   : > { %585 = dma.hbm_to_vmem [thread:$0]  (!%p835_p13), %s831_s12, 512, %s839_s14, %s841_s16, %s730_s13, %s730_s13, %s731_s17  }
  0x2c   : > { %p545_p9 = scmp.ge.s32.totalorder %s727_s21, 1  ;;  %p206_p1 = scmp.lt.s32.totalorder %s727_s21, 3 }
  0x2e   : > { %p207_p3 = pnand %p545_p9, %p206_p1 }
  0x2f   : > { %s872_s23 = sand.u32 (!%p207_p3), 1, %s719_s19  }
  0x30   : > { %210 = sbr.rel (%p207_p3) target bundleno = 790 (0x316), region = 40  ;;  %s546_s25 = sshll.u32 (!%p207_p3), %s872_s23, 5 }
  0x31   : > { %s213_s26 = scalar_lea.sflag (!%p207_p3), [#allocation3], %s872_s23  ;;  %s216_s28 = scalar_lea.vmem (!%p207_p3), [#allocation2], %s546_s25 }
  0x37   : > { %706 = dma.done.wait (%p811_p6), %s213_s26, 512  }
  0x38   : > { %708 = vsyncadd (%p811_p6), %s213_s26, 4294966784  ;;  %v243_v0 = vld [vmem:[%s216_s28] sm:$0xff]  ;;  %v244_v1 = vld [vmem:[%s216_s28 + $0x8] sm:$0xff]  ;;  %v732_v9 = vmov 0.0|0.0   ;;  %vm733_vm0 = vmmov 0   ;;  %v734_v10 = vmov 0.0   ;;  %v260_v11 = vlaneseq }
  0x39   : > { %v882_v2 = vld [vmem:[%s216_s28 + $0x10] sm:$0xff]  ;;  %v247_v3 = vadd.f32 %v244_v1, %v243_v0  ;;  %v884_v4 = vld [vmem:[%s216_s28 + $0x18] sm:$0xff]  ;;  %v255_v6 = vld [vmem:[%s958_s1] sm:$0xff]  ;;  %575 = vmatprep.subr.bf16.mxu0 %v732_v9  ;;  %567 = vmatprep.mubr.msk.f32.mxu0 %vm733_vm0, %v734_v10  ;;  %vm271_vm1 = vcmask 130112   ;;  %vm273_vm2 = vcmask 130048   ;;  %vm354_vm3 = vcmask 1043456  }
  0x3a   : > { %v250_v5 = vadd.f32 %v884_v4, %v882_v2  ;;  %v256_v7 = vld [vmem:[%s958_s1 + $0x8] sm:$0xff]  ;;  %570 = vmatprep.subr.mxu1 %v734_v10  ;;  %572 = vmatprep.mubr.msk.f32.mxu1 %vm733_vm0, %v734_v10  ;;  %v261_v12 = vand.u32 127, %v260_v11  ;;  %v263_v13 = vshrl.u32 %v260_v11, 7  ;;  %v348_v24 = vld [vmem:[%s960_s3] sm:$0xf]  ;;  %vm350_vm4 = vcmask 31744  }
  0x3b   : > { %248 = vadd.xlane.f32.xlu0 %v247_v3  ;;  %v576_v8 = vpack.c.bf16 %v256_v7, %v255_v6  ;;  %571 = vmatpush3.msk.msra.mxu1 %vm354_vm3, %v348_v24  ;;  %v257_v25 = vld [vmem:[%s959_s2] sm:$0x1]  ;;  %s242_s13 = scalar_lea.vmem [#allocation5], %s546_s25  ;;  %s557_s26 = sshll.u32 %s789_s22, 9 }
  0x3c   : > { %v266_v14 = vadd.s32 4294967288, %v261_v12  ;;  %v264_v16 = vsub.s32 %v261_v12, %v263_v13  ;;  %v349_v31 = vld [vmem:[%s961_s4] sm:$0x1]  ;;  %v435_v39 = vsub.s32 0, %v263_v13  ;;  %s466_s17 = sshll.u32 %s242_s13, 4  ;;  %s911_s14 = scalar_lea.hbm %s962_s5, %s557_s26  ;;  %s906_s17 = int_to_ptr.vmem [resolvable:$true] %s466_s17 }
  0x3d   : > { %577 = vmatpush3.bf16.msra.mxu0 %v576_v8  ;;  %s453_s22 = scalar_lea.sflag [#allocation4], %s872_s23  ;;  %s661_s25 = scalar_lea.vmem %s906_s17, 512 }
  0x3e   : > { %v269_v18 = vsub.s32 %v266_v14, %v263_v13  ;;  %p662_p6 = scmp.ne.s32.totalorder %s906_s17, %s661_s25  ;;  %p969_p11 = scmp.ne.s32.totalorder %s966_s30, 0 }
  0x3f   : > { %251 = vadd.xlane.f32.xlu0 %v250_v5  ;;  %s735_s15 = smov [#allocation5]  }
  0x40   : > { %p663_p12 = pnand %p662_p6, %p969_p11  ;;  %s665_s16 = sshll.u32 %s735_s15, 4  ;;  %s666_s16 = int_to_ptr.vmem [resolvable:$false] %s665_s16 }
  0x41   : > { %s667_s29 = scalar_lea.vmem %s666_s16, 1024  ;;  %p668_p8 = scmp.lt.s32.totalorder %s906_s17, %s666_s16 }
  0x42   : > { %p664_p13 = pneg %p663_p12  ;;  %p669_p10 = scmp.lt.s32.totalorder %s667_s29, %s661_s25 }
  0x44   : > { %p670_p0 = por %p669_p10, %p668_p8 }
  0x46   : > { %p671_p2 = pnand %p670_p0, %p664_p13 }
  0xc8   : > { %v249_v15 = vpop.xlane.xlu0 %248 }
  0xc9   : > { %v253_v17 = vmul.f32 0.00390625, %v249_v15 }
  0xcb   : > { %v265_v21 = vrot.slane %v253_v17, %v264_v16 }
  0xcc   : > { %v252_v19 = vpop.xlane.xlu0 %251 }
  0xcd   : > { %v254_v20 = vmul.f32 0.00390625, %v252_v19 }
  0xcf   : > { %v270_v22 = vrot.slane %v254_v20, %v269_v18 }
  0xd1   : > { %v272_v23 = vsel %vm271_vm1, %v270_v22, %v265_v21 }
  0xd2   : > { %568 = vmatmul.mubr.msk.f32.vlgmr.msra.gmra.mrb[0].mxu0 %vm273_vm2, %v272_v23 }
 0x1a5   : > { %v342_v26 = vpop.f32.mrb[0].mxu0 }
 0x1a6   : > { %v343_v27 = vadd.f32 %v342_v26, %v257_v25  ;;  %v569_v28 = vpop.f32.mrb[1].mxu0 }
 0x1a8   : > { %v346_v29 = vmax.f32 %v343_v27, 0.0 }
 0x1aa   : > { %v347_v30 = vmin.f32 %v346_v29, 6.0 }
 0x1ac   : > { %573 = vmatmul.mubr.msk.f32.vlgmr.msra.gmra.mrb[0].mxu1 %vm350_vm4, %v347_v30 }
 0x27f   : > { %v424_v32 = vpop.f32.mrb[0].mxu1 }
 0x280   : > { %v425_v33 = vadd.f32 %v424_v32, %v349_v31  ;;  %v574_v34 = vpop.f32.mrb[1].mxu1 }
 0x282   : > { %v428_v35 = vadd.f32 3.0, %v425_v33 }
 0x284   : > { %v429_v36 = vmax.f32 %v428_v35, 0.0 }
 0x286   : > { %v430_v37 = vmin.f32 %v429_v36, 6.0 }
 0x288   : > { %v431_v38 = vmul.f32 %v430_v37, %v425_v33 }
 0x28a   : > { %v432_v40 = vmul.f32 0.16666667, %v431_v38 }
 0x28c   : > { %v436_v41 = vrot.slane %v432_v40, %v435_v39 }
 0x28e   : > { %438 = vbcast.lane.b32.xlu1 %v436_v41, 256 }
 0x292   : > { %442 = vbcast.lane.b32.xlu1 %v436_v41, 264 }
 0x300   : > { %v439_v42 = vpop.permute.xlu1 %438 }
 0x301   : > { %v444_v43 = vmul.f32 %v439_v42, %v243_v0  ;;  %v445_v44 = vmul.f32 %v439_v42, %v244_v1 }
 0x303   : > { %448 = vst [vmem:[%s242_s13] sm:$0xff] %v444_v43  ;;  %449 = vst [vmem:[%s242_s13 + $0x8] sm:$0xff] %v445_v44 }
 0x304   : > { %v443_v45 = vpop.permute.xlu1 %442 }
 0x305   : > { %v446_v46 = vmul.f32 %v443_v45, %v882_v2  ;;  %v447_v47 = vmul.f32 %v443_v45, %v884_v4 }
 0x307   : > { %450 = vst [vmem:[%s242_s13 + $0x10] sm:$0xff] %v446_v46  ;;  %451 = vst [vmem:[%s242_s13 + $0x18] sm:$0xff] %v447_v47 }
 0x308   : > { %674 = shalt.err (!%p671_p2)
}
 0x309   : > { %s675_s8 = scalar_lea.hbm %s911_s14, 512  ;;  %s679_s10 = scalar_lea.hbm %s962_s5, 1024 }
 0x30a   : > { %p676_p4 = scmp.ne.s32.totalorder %s911_s14, %s675_s8  ;;  %p680_p9 = scmp.lt.u32.totalorder %s911_s14, %s962_s5 }
 0x30b   : > { %p681_p1 = scmp.lt.u32.totalorder %s679_s10, %s675_s8  ;;  %p683_p6 = scmp.lt.u32.totalorder %s675_s8, %s911_s14 }
 0x30c   : > { %p677_p5 = pnand %p676_p4, %p969_p11 }
 0x30d   : > { %p682_p3 = por %p681_p1, %p680_p9 }
 0x30e   : > { %p678_p7 = pneg %p677_p5 }
 0x30f   : > { %p684_p12 = por %p683_p6, %p682_p3 }
 0x311   : > { %p685_p13 = pnand %p684_p12, %p678_p7 }
 0x313   : > { %688 = shalt.err (!%p685_p13)
}
 0x314   : > { %s736_s26 = smov 256   ;;  %s737_s28 = smov 16  }
 0x315   : > { %580 = dma.vmem_to_hbm [thread:$0]  (%p969_p11), %s906_s17, 512, %s911_s14, %s453_s22, %s736_s26, %s736_s26, %s737_s28  }
 0x316 PF: > { %s481_s12 = sand.u32 1, %s715_s18   ;;  %p970_p8 = scmp.ne.s32.totalorder %s967_s6, 0 }
 0x317   : > { %p971_p10 = scmp.ge.s32.totalorder %s727_s21, 2  ;;  %s482_s25 = scalar_lea.sflag [#allocation4], %s481_s12 }
 0x319   : > { %p587_p0 = pnand %p971_p10, %p970_p8 }
 0x31b   : > { %710 = dma.done.wait (!%p587_p0), %s482_s25, 512  }
 0x31c   : > { %712 = vsyncadd (!%p587_p0), %s482_s25, 4294966784  ;;  %p18_p2 = scmp.ge.s32.totalorder %s793_s24, 4   ;;  %s972_s18 = smov %s719_s19 }
 0x31d   : > { %s973_s19 = smov %s723_s20  ;;  %s974_s20 = smov %s805_s27 }
 0x31e   : > { %s975_s21 = smov %s793_s24  ;;  %20 = sbr.rel (!%p18_p2) target bundleno = 5 (0x5), region = 85 }
 0x325   :  { %487 = vsyncpa [#allocation3], 1 }
 0x326   :  { %489 = vsyncpa [#allocation3 + $0x1], 1 }
 0x327   :  { %490 = vsyncpa [#allocation4], 1 }
 0x328   :  { %492 = vsyncpa [#allocation4 + $0x1], 1 }

</bundles_post_ra>
